<compile_context>
chip_gen: v7x
topology: tpu7x:2x2x1
jax: 0.10.0
libtpu: 0.0.40
codegen_flags: <defaults>
</compile_context>

<pallas_src>
import functools

import jax
import jax.numpy as jnp
from jax.experimental import pallas as pl
from jax.experimental.pallas import tpu as pltpu

LANE = 128


def _round_up(v, m):
    return ((v + m - 1) // m) * m


def _use_bf16_activations():
    """bf16 VPU/EUP exists on v6e/v7x; keep f32 activations on v5e and older."""
    try:
        kind = jax.devices()[0].device_kind.lower()
    except Exception:
        return False
    for old in ("v2", "v3", "v4", "v5"):
        if old in kind:
            return False
    return True


def mlp_kernel(x_ref, w1_ref, w23_ref, b_ref, o_ref, *, n_out, act_dtype):
    # x: (TILE_B, n_in) f32 | w1: (n_in, P) bf16 | w23: (2, P, P) bf16 | b: (3, P) f32
    x = x_ref[...].astype(jnp.bfloat16)                       # MXU-native operand dtype
    h = jnp.dot(x, w1_ref[...], preferred_element_type=jnp.float32)
    h = jnp.tanh((h + b_ref[0:1, :]).astype(act_dtype))       # bias-add (f32) + tanh (EUP)
    h = jnp.dot(h.astype(jnp.bfloat16), w23_ref[0], preferred_element_type=jnp.float32)
    h = jnp.tanh((h + b_ref[1:2, :]).astype(act_dtype))
    out = jnp.dot(h.astype(jnp.bfloat16), w23_ref[1], preferred_element_type=jnp.float32)
    # Store only the real output columns -> unpadded (TILE_B, n_out) HBM writeback.
    o_ref[...] = (out[:, :n_out] + b_ref[2:3, :n_out]).astype(o_ref.dtype)


def pack_params(params):
    """One-time packing of weights/biases for the kernel (do NOT call per forward).

    Weights stored (in, out). Hidden/output dims zero-padded to a lane-dense multiple
    of 128 (exact: padded weight rows/cols are zero and tanh(0)=0).
    """
    w1, b1 = params["w1"], params["b1"]
    w2, b2 = params["w2"], params["b2"]
    w3, b3 = params["w3"], params["b3"]
    n_in = w1.shape[0]
    h1, h2, n_out = w1.shape[1], w2.shape[1], w3.shape[1]
    P = _round_up(max(h1, h2, n_out), LANE)

    w1p = jnp.zeros((n_in, P), jnp.bfloat16).at[:, :h1].set(w1.astype(jnp.bfloat16))
    w2p = jnp.zeros((P, P), jnp.bfloat16).at[:h1, :h2].set(w2.astype(jnp.bfloat16))
    w3p = jnp.zeros((P, P), jnp.bfloat16).at[:h2, :n_out].set(w3.astype(jnp.bfloat16))
    w23 = jnp.stack([w2p, w3p])                                # single operand, layers 2+3
    bp = jnp.zeros((3, P), jnp.float32)
    bp = bp.at[0, :h1].set(b1.reshape(-1))
    bp = bp.at[1, :h2].set(b2.reshape(-1))
    bp = bp.at[2, :n_out].set(b3.reshape(-1))
    return {"w1p": w1p, "w23": w23, "bp": bp,
            "n_in": n_in, "n_out": n_out, "P": P}


def simple_mlp_forward(x, packed, *, tile_b=1024):
    """x: (B, n_input) f32. packed: output of pack_params()."""
    w1p, w23, bp = packed["w1p"], packed["w23"], packed["bp"]
    n_in, n_out, P = packed["n_in"], packed["n_out"], packed["P"]
    B = x.shape[0]

    tb = min(tile_b, B)
    # If a large batch would be a single grid step, split it so v7x's 2 TensorCores
    # both get work and the pipeline has >1 step (tb must stay a multiple of 8).
    if B > 512 and pl.cdiv(B, tb) < 2:
        tb = _round_up(pl.cdiv(B, 2), 8)
    grid = (pl.cdiv(B, tb),)

    act_dtype = jnp.bfloat16 if _use_bf16_activations() else jnp.float32
    kernel = functools.partial(mlp_kernel, n_out=n_out, act_dtype=act_dtype)

    return pl.pallas_call(
        kernel,
        out_shape=jax.ShapeDtypeStruct((B, n_out), jnp.float32),
        grid=grid,
        in_specs=[
            pl.BlockSpec((tb, n_in), lambda i: (i, 0)),        # batch-tiled input
            pl.BlockSpec((n_in, P), lambda i: (0, 0)),         # weights stay VMEM-resident
            pl.BlockSpec((2, P, P), lambda i: (0, 0, 0)),
            pl.BlockSpec((3, P), lambda i: (0, 0)),
        ],
        out_specs=pl.BlockSpec((tb, n_out), lambda i: (i, 0)), # unpadded output store
        compiler_params=pltpu.CompilerParams(
            dimension_semantics=("parallel",),
            vmem_limit_bytes=32 * 1024 * 1024,                 # fits v7x scoped VMEM easily
        ),
        cost_estimate=pl.CostEstimate(
            flops=2 * B * (n_in * P + 2 * P * P),
            transcendentals=2 * B * P,
            bytes_accessed=(B * n_in * 4 + n_in * P * 2 + 2 * P * P * 2
                            + 3 * P * 4 + B * n_out * 4),
        ),
    )(x, w1p, w23, bp)


def init_params(key, n_input, n_output, hidden_dims=(64, 64)):
    """Deterministic init mirroring nn.Linear's uniform(-1/sqrt(fan_in), 1/sqrt(fan_in))."""
    dims = [n_input] + list(hidden_dims) + [n_output]
    params = {}
    for i in range(len(dims) - 1):
        fan_in, fan_out = dims[i], dims[i + 1]
        key, kw, kb = jax.random.split(key, 3)
        bound = 1.0 / jnp.sqrt(jnp.float32(fan_in))
        params[f"w{i+1}"] = jax.random.uniform(
            kw, (fan_in, fan_out), jnp.float32, -bound, bound)
        params[f"b{i+1}"] = jax.random.uniform(
            kb, (1, fan_out), jnp.float32, -bound, bound)
    return params


def reference_forward(x, params):
    h = jnp.tanh(x @ params["w1"] + params["b1"])
    h = jnp.tanh(h @ params["w2"] + params["b2"])
    return h @ params["w3"] + params["b3"]


if __name__ == "__main__":
    key = jax.random.PRNGKey(0)
    B, n_input, n_output = 8, 32, 16

    key, kx = jax.random.split(key)
    x = jax.random.normal(kx, (B, n_input), jnp.float32)
    params = init_params(key, n_input, n_output, hidden_dims=(64, 64))

    packed = pack_params(params)            # one-time packing, outside the forward path
    out = simple_mlp_forward(x, packed)
    out = jax.block_until_ready(out)

    ref = reference_forward(x, params)
    assert out.shape == (B, n_output)
    # bf16 MXU operands (f32 accumulation): loosen tolerance vs the pure-f32 reference.
    assert jnp.allclose(out, ref, atol=2e-2, rtol=2e-2), float(jnp.max(jnp.abs(out - ref)))
    print("KERNEL_OK")
</pallas_src>

<mosaic_0001>
module attributes {stable_mosaic.version = 11 : i64} {
  func.func @mlp_kernel(%arg0: i32, %arg1: memref<8x32xf32, #tpu.memory_space<vmem>>, %arg2: memref<32x128xbf16, #tpu.memory_space<vmem>>, %arg3: memref<2x128x128xbf16, #tpu.memory_space<vmem>>, %arg4: memref<3x128xf32, #tpu.memory_space<vmem>>, %arg5: memref<8x16xf32, #tpu.memory_space<vmem>>) attributes {dimension_semantics = [#tpu.dimension_semantics<parallel>], iteration_bounds = array<i64: 1>, scalar_prefetch = 0 : i64, scratch_operands = 0 : i64, tpu.core_type = #tpu.core_type<tc>, window_params = [{transform_indices = @transform_0, window_bounds = array<i64: 8, 32>}, {pipeline_mode = #tpu.pipeline_mode<synchronous>, transform_indices = @transform_1, window_bounds = array<i64: 32, 128>}, {pipeline_mode = #tpu.pipeline_mode<synchronous>, transform_indices = @transform_2, window_bounds = array<i64: 2, 128, 128>}, {pipeline_mode = #tpu.pipeline_mode<synchronous>, transform_indices = @transform_3, window_bounds = array<i64: 3, 128>}, {transform_indices = @transform_4, window_bounds = array<i64: 8, 16>}]} {
    %c0 = arith.constant 0 : index
    %c0_0 = arith.constant 0 : index
    %0 = vector.load %arg1[%c0, %c0_0] : memref<8x32xf32, #tpu.memory_space<vmem>>, vector<8x32xf32>
    %1 = arith.truncf %0 : vector<8x32xf32> to vector<8x32xbf16>
    %c0_1 = arith.constant 0 : index
    %c0_2 = arith.constant 0 : index
    %2 = vector.load %arg2[%c0_1, %c0_2] : memref<32x128xbf16, #tpu.memory_space<vmem>>, vector<32x128xbf16>
    %cst = arith.constant dense<0.000000e+00> : vector<8x128xf32>
    %3 = tpu.matmul %1, %2, %cst {dimension_numbers = #tpu.dot_dimension_numbers<[1], [0], [0], [1], [0, 0, 1, 1], [], []>} : vector<8x32xbf16>, vector<32x128xbf16>, vector<8x128xf32> -> vector<8x128xf32>
    %c0_3 = arith.constant 0 : index
    %c0_4 = arith.constant 0 : index
    %4 = vector.load %arg4[%c0_3, %c0_4] : memref<3x128xf32, #tpu.memory_space<vmem>>, vector<1x128xf32>
    %5 = vector.broadcast %4 : vector<1x128xf32> to vector<8x128xf32>
    %6 = arith.addf %3, %5 : vector<8x128xf32>
    %7 = arith.truncf %6 : vector<8x128xf32> to vector<8x128xbf16>
    %8 = math.tanh %7 : vector<8x128xbf16>
    %c0_5 = arith.constant 0 : index
    %c0_6 = arith.constant 0 : index
    %c0_7 = arith.constant 0 : index
    %9 = vector.load %arg3[%c0_5, %c0_6, %c0_7] : memref<2x128x128xbf16, #tpu.memory_space<vmem>>, vector<1x128x128xbf16>
    %10 = vector.shape_cast %9 : vector<1x128x128xbf16> to vector<128x128xbf16>
    %cst_8 = arith.constant dense<0.000000e+00> : vector<8x128xf32>
    %11 = tpu.matmul %8, %10, %cst_8 {dimension_numbers = #tpu.dot_dimension_numbers<[1], [0], [0], [1], [0, 0, 1, 1], [], []>} : vector<8x128xbf16>, vector<128x128xbf16>, vector<8x128xf32> -> vector<8x128xf32>
    %c1 = arith.constant 1 : index
    %c0_9 = arith.constant 0 : index
    %12 = vector.load %arg4[%c1, %c0_9] : memref<3x128xf32, #tpu.memory_space<vmem>>, vector<1x128xf32>
    %13 = vector.broadcast %12 : vector<1x128xf32> to vector<8x128xf32>
    %14 = arith.addf %11, %13 : vector<8x128xf32>
    %15 = arith.truncf %14 : vector<8x128xf32> to vector<8x128xbf16>
    %16 = math.tanh %15 : vector<8x128xbf16>
    %c1_10 = arith.constant 1 : index
    %c0_11 = arith.constant 0 : index
    %c0_12 = arith.constant 0 : index
    %17 = vector.load %arg3[%c1_10, %c0_11, %c0_12] : memref<2x128x128xbf16, #tpu.memory_space<vmem>>, vector<1x128x128xbf16>
    %18 = vector.shape_cast %17 : vector<1x128x128xbf16> to vector<128x128xbf16>
    %cst_13 = arith.constant dense<0.000000e+00> : vector<8x128xf32>
    %19 = tpu.matmul %16, %18, %cst_13 {dimension_numbers = #tpu.dot_dimension_numbers<[1], [0], [0], [1], [0, 0, 1, 1], [], []>} : vector<8x128xbf16>, vector<128x128xbf16>, vector<8x128xf32> -> vector<8x128xf32>
    %20 = vector.extract_strided_slice %19 {offsets = [0, 0], sizes = [8, 16], strides = [1, 1]} : vector<8x128xf32> to vector<8x16xf32>
    %c2 = arith.constant 2 : index
    %c0_14 = arith.constant 0 : index
    %21 = vector.load %arg4[%c2, %c0_14] : memref<3x128xf32, #tpu.memory_space<vmem>>, vector<1x16xf32>
    %22 = vector.broadcast %21 : vector<1x16xf32> to vector<8x16xf32>
    %23 = arith.addf %20, %22 : vector<8x16xf32>
    %c0_15 = arith.constant 0 : index
    %c0_16 = arith.constant 0 : index
    %24 = vector.load %arg5[%c0_15, %c0_16] : memref<8x16xf32, #tpu.memory_space<vmem>>, vector<8x16xf32>
    tpu.vector_store %arg5[%c0_15, %c0_16], %23 {strides = array<i32>} : memref<8x16xf32, #tpu.memory_space<vmem>>, vector<8x16xf32>,
    return
  }
  func.func @transform_0(%arg0: i32) -> (i32, i32) {
    %c0_i32 = arith.constant 0 : i32
    %c0_i32_0 = arith.constant 0 : i32
    return %arg0, %c0_i32 : i32, i32
  }
  func.func @transform_1(%arg0: i32) -> (i32, i32) {
    %c0_i32 = arith.constant 0 : i32
    %c0_i32_0 = arith.constant 0 : i32
    %c0_i32_1 = arith.constant 0 : i32
    return %c0_i32, %c0_i32_0 : i32, i32
  }
  func.func @transform_2(%arg0: i32) -> (i32, i32, i32) {
    %c0_i32 = arith.constant 0 : i32
    %c0_i32_0 = arith.constant 0 : i32
    %c0_i32_1 = arith.constant 0 : i32
    %c0_i32_2 = arith.constant 0 : i32
    return %c0_i32, %c0_i32_0, %c0_i32_1 : i32, i32, i32
  }
  func.func @transform_3(%arg0: i32) -> (i32, i32) {
    %c0_i32 = arith.constant 0 : i32
    %c0_i32_0 = arith.constant 0 : i32
    %c0_i32_1 = arith.constant 0 : i32
    return %c0_i32, %c0_i32_0 : i32, i32
  }
  func.func @transform_4(%arg0: i32) -> (i32, i32) {
    %c0_i32 = arith.constant 0 : i32
    %c0_i32_0 = arith.constant 0 : i32
    return %arg0, %c0_i32 : i32, i32
  }
}

</mosaic_0001>

<bundles_post_ra>
// kernel: tpu_custom_call.1
= control target key start
LH: loop header
LB: loop body
LE: loop exit
PB: predicated region body
PF: predicated region fallthrough
CT: control target
= control target key end

     0   :  { %9 = vsyncpa [#allocation3], 0  ;;  %s702_s0 = inlined_call_operand.hbm [shape: f32[8,32], index: 0, kind: input, shape index: {}]   ;;  %s703_s1 = inlined_call_operand.hbm [shape: bf16[32,128], index: 1, kind: input, shape index: {}]   ;;  %s704_s2 = inlined_call_operand.hbm [shape: bf16[2,128,128], index: 2, kind: input, shape index: {}]   ;;  %s705_s3 = inlined_call_operand.vmem [shape: f32[3,128], index: 3, kind: input, shape index: {}]   ;;  %s706_s4 = inlined_call_operand.hbm [shape: f32[8,16], index: 4, kind: output, shape index: {}]  }
   0x1   :  { %10 = vsyncpa [#allocation6], 0 }
   0x2   :  { %11 = vsyncpa [#allocation4], 0  ;;  %s582_s15 = smov [#allocation5]   ;;  %s488_s19 = scalar_lea.hbm %s703_s1, 256 }
   0x3   :  { %s27_s16 = sshll.u32 %s582_s15, 4  ;;  %p489_p0 = scmp.ne.s32.totalorder %s703_s1, %s488_s19  ;;  %s28_s16 = int_to_ptr.vmem [resolvable:$true] %s27_s16 }
   0x4   :  { %p492_p1 = scmp.lt.u32.totalorder %s488_s19, %s703_s1 }
   0x6   :  { %p494_p2 = pnand %p492_p1, %p489_p0 }
   0x8   :  { %497 = shalt.err (!%p494_p2)
}
   0x9   :  { %s498_s24 = scalar_lea.vmem %s28_s16, 256  ;;  %p503_p4 = scmp.lt.s32.totalorder %s28_s16, %s28_s16 }
   0xa   :  { %p499_p3 = scmp.ne.s32.totalorder %s28_s16, %s498_s24  ;;  %p504_p5 = scmp.lt.s32.totalorder %s498_s24, %s498_s24 }
   0xc   :  { %p505_p6 = por %p504_p5, %p503_p4 }
   0xe   :  { %p506_p7 = pnand %p505_p6, %p499_p3 }
  0x10   :  { %509 = shalt.err (!%p506_p7)
}
  0x11   :  { %s583_s25 = smov 64   ;;  %s584_s26 = smov 4  }
  0x12   :  { %33 = dma.hbm_to_vmem [thread:$0]  %s703_s1, 256, %s28_s16, [#allocation6], %s583_s25, %s583_s25, %s584_s26  }
  0x13   :  { %s585_s29 = smov [#allocation2]   ;;  %s586_s5 = smov [#allocation7]  }
  0x14   :  { %s18_s30 = sshll.u32 %s585_s29, 4  ;;  %s39_s6 = sshll.u32 %s586_s5, 4  ;;  %s19_s30 = int_to_ptr.vmem [resolvable:$true] %s18_s30  ;;  %s40_s6 = int_to_ptr.vmem [resolvable:$true] %s39_s6 }
  0x15   :  { %s510_s9 = scalar_lea.hbm %s702_s0, 128 }
  0x16   :  { %p511_p8 = scmp.ne.s32.totalorder %s702_s0, %s510_s9  ;;  %p514_p9 = scmp.lt.u32.totalorder %s510_s9, %s702_s0 }
  0x18   :  { %p516_p10 = pnand %p514_p9, %p511_p8 }
  0x1a   :  { %519 = shalt.err (!%p516_p10)
}
  0x1b   :  { %s520_s1 = scalar_lea.vmem %s19_s30, 128  ;;  %p525_p12 = scmp.lt.s32.totalorder %s19_s30, %s19_s30 }
  0x1c   :  { %p521_p11 = scmp.ne.s32.totalorder %s19_s30, %s520_s1  ;;  %p526_p13 = scmp.lt.s32.totalorder %s520_s1, %s520_s1 }
  0x1e   :  { %p527_p0 = por %p526_p13, %p525_p12 }
  0x20   :  { %p528_p1 = pnand %p527_p0, %p521_p11 }
  0x22   :  { %531 = shalt.err (!%p528_p1)
}
  0x23   :  { %21 = dma.hbm_to_vmem [thread:$0]  %s702_s0, 128, %s19_s30, [#allocation3]  }
  0x24   :  { %s532_s18 = scalar_lea.hbm %s704_s2, 2048 }
  0x25   :  { %p533_p2 = scmp.ne.s32.totalorder %s704_s2, %s532_s18  ;;  %p536_p3 = scmp.lt.u32.totalorder %s532_s18, %s704_s2 }
  0x27   :  { %p538_p4 = pnand %p536_p3, %p533_p2 }
  0x29   :  { %541 = shalt.err (!%p538_p4)
}
  0x2a   :  { %s542_s23 = scalar_lea.vmem %s40_s6, 2048  ;;  %p547_p6 = scmp.lt.s32.totalorder %s40_s6, %s40_s6 }
  0x2b   :  { %p543_p5 = scmp.ne.s32.totalorder %s40_s6, %s542_s23  ;;  %p548_p7 = scmp.lt.s32.totalorder %s542_s23, %s542_s23 }
  0x2d   :  { %p549_p8 = por %p548_p7, %p547_p6 }
  0x2f   :  { %p550_p9 = pnand %p549_p8, %p543_p5 }
  0x31   :  { %553 = shalt.err (!%p550_p9)
}
  0x32   :  { %45 = dma.hbm_to_vmem [thread:$0]  %s704_s2, 2048, %s40_s6, [#allocation6], %s583_s25, %s583_s25, %s584_s26  }
  0x33   :  { %576 = dma.done.wait [#allocation3], 128  }
  0x34   :  { %577 = vsyncadd [#allocation3], 4294967168 }
  0x35   :  { %578 = dma.done.wait [#allocation6], 2304  }
  0x36   :  { %579 = vsyncadd [#allocation6], 4294964992  ;;  %v587_v0 = vmov 0.0   ;;  %vm588_vm0 = vmmov 0   ;;  %v466_v1 = vld [vmem:[#allocation5] sm:$0xff]   ;;  %v467_v2 = vld [vmem:[#allocation5 + $0x8] sm:$0xff]  }
  0x37   :  { %410 = vmatprep.subr.bf16.mxu0 %v587_v0  ;;  %414 = vmatprep.mubr.msk.bf16.mxu0 %vm588_vm0, %v587_v0  ;;  %v58_v3 = vld [vmem:[#allocation2] sm:$0xff]  ;;  %v468_v4 = vld [vmem:[#allocation7] sm:$0xff]   ;;  %vm81_vm1 = vcmask 261120   ;;  %v470_v7 = vld [vmem:[#allocation7 + $0x10] sm:$0xff]   ;;  %s589_s30 = smov [#allocation8]   ;;  %vm349_vm2 = vcmask 130048  }
  0x38   :  { %418 = vmatprep.subr.bf16.mxu1 %v587_v0  ;;  %434 = vmatprep.mubr.msk.bf16.mxu1 %vm588_vm0, %v587_v0  ;;  %v59_v5 = vpack.c.bf16 %v58_v3, %v58_v3  ;;  %v469_v6 = vld [vmem:[#allocation7 + $0x8] sm:$0xff]   ;;  %v471_v8 = vld [vmem:[#allocation7 + $0x18] sm:$0xff]   ;;  %v472_v9 = vld [vmem:[#allocation7 + $0x20] sm:$0xff]   ;;  %s357_s5 = sshll.u32 %s589_s30, 4  ;;  %s358_s5 = int_to_ptr.vmem [resolvable:$true] %s357_s5 }
  0x39   :  { %411 = vmatpush3.bf16.msra.mxu0 %v466_v1  ;;  %419 = vmatpush3.bf16.msra.mxu1 %v468_v4  ;;  %v473_v10 = vld [vmem:[#allocation7 + $0x28] sm:$0xff]   ;;  %v474_v11 = vld [vmem:[#allocation7 + $0x30] sm:$0xff]   ;;  %v475_v12 = vld [vmem:[#allocation7 + $0x38] sm:$0xff]   ;;  %s554_s6 = scalar_lea.vmem %s358_s5, 128  ;;  %p559_p11 = scmp.lt.s32.totalorder %s358_s5, %s358_s5 }
  0x3a   :  { %412 = vmatprep.subr.bf16.mxu0 %v587_v0  ;;  %420 = vmatprep.subr.bf16.mxu1 %v587_v0  ;;  %v476_v13 = vld [vmem:[#allocation7 + $0x40] sm:$0xff]   ;;  %v477_v14 = vld [vmem:[#allocation7 + $0x48] sm:$0xff]   ;;  %v478_v15 = vld [vmem:[#allocation7 + $0x50] sm:$0xff]   ;;  %p555_p10 = scmp.ne.s32.totalorder %s358_s5, %s554_s6  ;;  %p560_p12 = scmp.lt.s32.totalorder %s554_s6, %s554_s6 }
  0x3b   :  { %v479_v16 = vld [vmem:[#allocation7 + $0x58] sm:$0xff]   ;;  %v367_v17 = vld [vmem:[%s705_s3] ss:$0 sm:$0xff]  ;;  %v480_v25 = vld [vmem:[#allocation7 + $0x60] sm:$0xff]  }
  0x3c   :  { %v481_v26 = vld [vmem:[#allocation7 + $0x68] sm:$0xff]   ;;  %v482_v27 = vld [vmem:[#allocation7 + $0x70] sm:$0xff]   ;;  %v483_v28 = vld [vmem:[#allocation7 + $0x78] sm:$0xff]   ;;  %p561_p13 = por %p560_p12, %p559_p11 }
  0x3d   :  { %413 = vmatpush3.bf16.msra.mxu0 %v467_v2  ;;  %421 = vmatpush3.bf16.msra.mxu1 %v469_v6  ;;  %v371_v29 = vld [vmem:[%s705_s3 + $0x1] ss:$0 sm:$0xff]  ;;  %v388_v37 = vld [vmem:[%s705_s3 + $0x2] ss:$0 sm:$0xff] }
  0x3e   :  { %438 = vmatprep.subr.bf16.mxu0 %v587_v0  ;;  %422 = vmatprep.subr.bf16.mxu1 %v587_v0  ;;  %p562_p0 = pnand %p561_p13, %p555_p10 }
  0x40   :  { %415 = vmatmul.mubr.msk.bf16.vlgmr.msra.gmra.mrb[0].mxu0 %vm81_vm1, %v59_v5 }
  0x41   :  { %454 = vmatprep.mubr.msk.bf16.mxu0 %vm588_vm0, %v587_v0  ;;  %423 = vmatpush3.bf16.msra.mxu1 %v470_v7 }
  0x42   :  { %424 = vmatprep.subr.bf16.mxu1 %v587_v0  ;;  %439 = vmatpush3.bf16.msra.mxu0 %v476_v13 }
  0x43   :  { %440 = vmatprep.subr.bf16.mxu0 %v587_v0 }
  0x45   :  { %425 = vmatpush3.bf16.msra.mxu1 %v471_v8 }
  0x46   :  { %426 = vmatprep.subr.bf16.mxu1 %v587_v0  ;;  %441 = vmatpush3.bf16.msra.mxu0 %v477_v14 }
  0x47   :  { %442 = vmatprep.subr.bf16.mxu0 %v587_v0 }
  0x49   :  { %427 = vmatpush3.bf16.msra.mxu1 %v472_v9 }
  0x4a   :  { %428 = vmatprep.subr.bf16.mxu1 %v587_v0  ;;  %443 = vmatpush3.bf16.msra.mxu0 %v478_v15 }
  0x4b   :  { %444 = vmatprep.subr.bf16.mxu0 %v587_v0 }
  0x4d   :  { %429 = vmatpush3.bf16.msra.mxu1 %v473_v10 }
  0x4e   :  { %430 = vmatprep.subr.bf16.mxu1 %v587_v0  ;;  %445 = vmatpush3.bf16.msra.mxu0 %v479_v16 }
  0x4f   :  { %446 = vmatprep.subr.bf16.mxu0 %v587_v0 }
  0x51   :  { %431 = vmatpush3.bf16.msra.mxu1 %v474_v11 }
  0x52   :  { %432 = vmatprep.subr.bf16.mxu1 %v587_v0  ;;  %447 = vmatpush3.bf16.msra.mxu0 %v480_v25 }
  0x53   :  { %448 = vmatprep.subr.bf16.mxu0 %v587_v0 }
  0x55   :  { %433 = vmatpush3.bf16.msra.mxu1 %v475_v12 }
  0x56   :  { %449 = vmatpush3.bf16.msra.mxu0 %v481_v26 }
  0x57   :  { %450 = vmatprep.subr.bf16.mxu0 %v587_v0 }
  0x5a   :  { %451 = vmatpush3.bf16.msra.mxu0 %v482_v27 }
  0x5b   :  { %452 = vmatprep.subr.bf16.mxu0 %v587_v0 }
  0x5e   :  { %453 = vmatpush3.bf16.msra.mxu0 %v483_v28 }
 0x113   :  { %v119_v18 = vpop.f32.mrb[0].mxu0 }
 0x114   :  { %v120_v19 = vadd.f32 %v367_v17, %v119_v18  ;;  %v416_v20 = vpop.f32.mrb[1].mxu0 }
 0x115   :  { %v122_v21 = vpop.f32.mrb[2].mxu0 }
 0x116   :  { %v125_v22 = vpack.c.bf16 %v120_v19, %v120_v19  ;;  %v417_v23 = vpop.f32.mrb[3].mxu0 }
 0x118   :  { %484 = vtanh.bf16 %v125_v22 }
 0x123   :  { %v485_v24 = vpop.eup %484 }
 0x124   :  { %435 = vmatmul.mubr.bf16.vlgmr.msra.gmra.mrb[0].mxu1 %v485_v24 }
 0x1f7   :  { %v230_v30 = vpop.f32.mrb[0].mxu1 }
 0x1f8   :  { %v231_v31 = vadd.f32 %v371_v29, %v230_v30  ;;  %v436_v32 = vpop.f32.mrb[1].mxu1 }
 0x1f9   :  { %v233_v33 = vpop.f32.mrb[2].mxu1 }
 0x1fa   :  { %v236_v34 = vpack.c.bf16 %v231_v31, %v231_v31  ;;  %v437_v35 = vpop.f32.mrb[3].mxu1 }
 0x1fc   :  { %486 = vtanh.bf16 %v236_v34 }
 0x207   :  { %v487_v36 = vpop.eup %486 }
 0x208   :  { %455 = vmatmul.mubr.bf16.vlgmr.msra.gmra.mrb[4].mxu0 %v487_v36 }
 0x2db   :  { %v337_v38 = vpop.f32.mrb[4].mxu0 }
 0x2dc   :  { %v348_v39 = vadd.f32 %v388_v37, %v337_v38  ;;  %v456_v40 = vpop.f32.mrb[5].mxu0 }
 0x2dd   :  { %v340_v41 = vpop.f32.mrb[6].mxu0 }
 0x2de   :  { %v457_v42 = vpop.f32.mrb[7].mxu0  ;;  %350 = vst.msk [vmem:[#allocation8] sm:$0xff] %vm349_vm2, %v348_v39 }
 0x2df   :  { %565 = shalt.err (!%p562_p0)
}
 0x2e0   :  { %s566_s3 = scalar_lea.hbm %s706_s4, 128 }
 0x2e1   :  { %p567_p1 = scmp.ne.s32.totalorder %s706_s4, %s566_s3  ;;  %p570_p2 = scmp.lt.u32.totalorder %s566_s3, %s706_s4 }
 0x2e3   :  { %p572_p3 = pnand %p570_p2, %p567_p1 }
 0x2e5   :  { %575 = shalt.err (!%p572_p3)
}
 0x2e6   :  { %360 = dma.vmem_to_hbm [thread:$0]  %s358_s5, 128, %s706_s4, [#allocation4]  }
 0x2e7   :  { %580 = dma.done.wait [#allocation4], 128  }
 0x2e8   :  { %581 = vsyncadd [#allocation4], 4294967168 }
 0x2e9   :  { %364 = vsyncpa [#allocation3], 1 }
 0x2ea   :  { %365 = vsyncpa [#allocation6], 1 }
 0x2eb   :  { %366 = vsyncpa [#allocation4], 1 }

</bundles_post_ra>
